<compile_context>
chip_gen: v7x
topology: tpu7x:2x2x1
jax: 0.10.0
libtpu: 0.0.40
codegen_flags: <defaults>
</compile_context>

<pallas_src>
import functools

import jax
import jax.numpy as jnp
from jax.experimental import pallas as pl
from jax.experimental.pallas import tpu as pltpu


def _euclid_kernel(x_ref, w_ref, b_ref, o_ref):
    # x_ref: (BM, D) input tile, w_ref: (D, TN) tile of stored vectors,
    # b_ref: (1, TN) precomputed sum(W^2, axis=0) tile, o_ref: (BM, TN) output.
    xy = jnp.dot(x_ref[...], w_ref[...], preferred_element_type=jnp.float32)
    o_ref[...] = (xy + b_ref[...].astype(jnp.float32)).astype(o_ref.dtype)


def _round_up(a, b):
    return (a + b - 1) // b * b


def _pick_tiles(B, D, N, itemsize, desired_bm, desired_tn, vmem_budget):
    """Pick (bm, tn) tiles: as large as possible within the VMEM budget."""
    bm = min(desired_bm, _round_up(B, 8))
    tn = min(desired_tn, _round_up(N, 128))

    def est(bm_, tn_):
        # double-buffered x tile + W tile + bias tile + output tile
        return 2 * itemsize * (bm_ * D + D * tn_ + tn_ + bm_ * tn_)

    while est(bm, tn) > vmem_budget and (tn > 128 or bm > 8):
        if tn > 128:
            tn = max(128, tn // 2)
        else:
            bm = max(8, bm // 2)
    # TODO(synk): if D is so large that even an (8, 128) tile exceeds the VMEM
    # budget, add a K grid axis with an accumulator scratch (pl.when init).
    return bm, tn, est(bm, tn)


@functools.partial(jax.jit, static_argnames=("desired_bm", "desired_tn"))
def euclidean_distance_forward(x, weight, *, desired_bm=256, desired_tn=512):
    """Pallas equivalent of EuclideanDistance.forward(engine, x).

    x:      (B, D) float32
    weight: (D, N) float32  (one column == one stored vector)
    returns (B, N) float32  == x @ W + sum(W**2, axis=0)
    (the split_square_len factor in the PyTorch module cancels exactly.)
    """
    B, D = x.shape
    D2, N = weight.shape
    assert D == D2, "The input and weight shape is not matched"

    itemsize = jnp.dtype(x.dtype).itemsize
    vmem_budget = 48 * (1 << 20)  # conservative (v7x physical VMEM is 64 MiB)
    bm, tn, vmem_est = _pick_tiles(
        B, D, N, itemsize, desired_bm, desired_tn, vmem_budget
    )

    # Precompute the "bias" contribution once (y^2, in f32 for accuracy).
    bias = jnp.sum(weight.astype(jnp.float32) ** 2, axis=0, keepdims=True)
    bias = bias.astype(x.dtype)  # (1, N)

    # Pad to tile multiples so every grid step sees a full, in-bounds block.
    Bp = _round_up(B, bm)
    Np = _round_up(N, tn)
    if Bp != B:
        x = jnp.pad(x, ((0, Bp - B), (0, 0)))
    if Np != N:
        weight = jnp.pad(weight, ((0, 0), (0, Np - N)))
        bias = jnp.pad(bias, ((0, 0), (0, Np - N)))

    nb, nn = Bp // bm, Np // tn

    # Choose grid order so the operand that would be re-streamed (outer-loop
    # multiplied) is the smaller one.  Inner grid axis streams; the other
    # operand stays resident across it.
    traffic_b_outer = nb * D * Np + Bp * D   # W re-read per batch tile
    traffic_n_outer = nn * Bp * D + D * Np   # x re-read per N tile
    if traffic_b_outer <= traffic_n_outer:
        grid = (nb, nn)                      # inner axis = N (stream W)
        x_map = lambda i, j: (i, 0)
        w_map = lambda i, j: (0, j)
        b_map = lambda i, j: (0, j)
        o_map = lambda i, j: (i, j)
    else:
        grid = (nn, nb)                      # inner axis = B (stream x)
        x_map = lambda j, i: (i, 0)
        w_map = lambda j, i: (0, j)
        b_map = lambda j, i: (0, j)
        o_map = lambda j, i: (i, j)

    cost = pl.CostEstimate(
        flops=2 * B * D * N + B * N,
        transcendentals=0,
        bytes_accessed=itemsize * (D * N + B * D + B * N + N),
    )

    out = pl.pallas_call(
        _euclid_kernel,
        out_shape=jax.ShapeDtypeStruct((Bp, Np), x.dtype),
        grid_spec=pltpu.PrefetchScalarGridSpec(
            num_scalar_prefetch=0,
            grid=grid,
            in_specs=[
                pl.BlockSpec((bm, D), x_map),   # x tile
                pl.BlockSpec((D, tn), w_map),   # W tile
                pl.BlockSpec((1, tn), b_map),   # precomputed y^2 tile
            ],
            out_specs=pl.BlockSpec((bm, tn), o_map),
        ),
        compiler_params=pltpu.CompilerParams(
            dimension_semantics=("parallel", "parallel"),
            vmem_limit_bytes=min(
                max(32 * (1 << 20), vmem_est + (4 << 20)), 60 * (1 << 20)
            ),
        ),
        cost_estimate=cost,
    )(x, weight, bias)

    if Bp != B or Np != N:
        out = out[:B, :N]
    return out


if __name__ == "__main__":
    key = jax.random.PRNGKey(0)
    kx, kw = jax.random.split(key)

    B, D, N = 8, 32, 256        # batch, vector dim, number of stored vectors
    split_square_len = 4

    x = jax.random.normal(kx, (B, D), dtype=jnp.float32)
    vectors = jax.random.normal(kw, (D, N), dtype=jnp.float32)  # columns = stored vectors

    out = euclidean_distance_forward(x, vectors)
    out = jax.block_until_ready(out)

    # Reference: augmented matmul exactly as the PyTorch forward builds it.
    bias_ref = jnp.sum(vectors ** 2, axis=0, keepdims=True) / split_square_len
    temp = jnp.concatenate(
        [vectors, jnp.tile(bias_ref, (split_square_len, 1))], axis=0
    )
    x_aug = jnp.concatenate(
        [x, jnp.ones((B, split_square_len), dtype=x.dtype)], axis=-1
    )
    ref = x_aug @ temp

    assert out.shape == (B, N)
    assert jnp.allclose(out, ref, atol=1e-4, rtol=1e-4)

    # Also exercise a non-tile-multiple shape (padding / slicing path) and the
    # alternate grid ordering (large B relative to N).
    B2, N2 = 10, 200
    x2 = jax.random.normal(kx, (B2, D), dtype=jnp.float32)
    v2 = jax.random.normal(kw, (D, N2), dtype=jnp.float32)
    out2 = jax.block_until_ready(euclidean_distance_forward(x2, v2))
    ref2 = x2 @ v2 + jnp.sum(v2 ** 2, axis=0, keepdims=True)
    assert out2.shape == (B2, N2)
    assert jnp.allclose(out2, ref2, atol=1e-4, rtol=1e-4)

    B3, N3 = 1024, 128
    x3 = jax.random.normal(kx, (B3, D), dtype=jnp.float32)
    v3 = jax.random.normal(kw, (D, N3), dtype=jnp.float32)
    out3 = jax.block_until_ready(euclidean_distance_forward(x3, v3))
    ref3 = x3 @ v3 + jnp.sum(v3 ** 2, axis=0, keepdims=True)
    assert out3.shape == (B3, N3)
    assert jnp.allclose(out3, ref3, atol=1e-4, rtol=1e-4)

    print("KERNEL_OK")
</pallas_src>

<mosaic_0001>
module attributes {stable_mosaic.version = 11 : i64} {
  func.func @_euclid_kernel(%arg0: i32, %arg1: i32, %arg2: memref<8x32xf32, #tpu.memory_space<vmem>>, %arg3: memref<32x256xf32, #tpu.memory_space<vmem>>, %arg4: memref<1x256xf32, #tpu.memory_space<vmem>>, %arg5: memref<8x256xf32, #tpu.memory_space<vmem>>) attributes {dimension_semantics = [#tpu.dimension_semantics<parallel>, #tpu.dimension_semantics<parallel>], iteration_bounds = array<i64: 1, 1>, scalar_prefetch = 0 : i64, scratch_operands = 0 : i64, tpu.core_type = #tpu.core_type<tc>, window_params = [{transform_indices = @transform_0, window_bounds = array<i64: 8, 32>}, {transform_indices = @transform_1, window_bounds = array<i64: 32, 256>}, {transform_indices = @transform_2, window_bounds = array<i64: 1, 256>}, {transform_indices = @transform_3, window_bounds = array<i64: 8, 256>}]} {
    %c0 = arith.constant 0 : index
    %c0_0 = arith.constant 0 : index
    %0 = vector.load %arg2[%c0, %c0_0] : memref<8x32xf32, #tpu.memory_space<vmem>>, vector<8x32xf32>
    %c0_1 = arith.constant 0 : index
    %c0_2 = arith.constant 0 : index
    %1 = vector.load %arg3[%c0_1, %c0_2] : memref<32x256xf32, #tpu.memory_space<vmem>>, vector<32x256xf32>
    %cst = arith.constant dense<0.000000e+00> : vector<8x256xf32>
    %2 = tpu.matmul %0, %1, %cst {dimension_numbers = #tpu.dot_dimension_numbers<[1], [0], [0], [1], [0, 0, 1, 1], [], []>} : vector<8x32xf32>, vector<32x256xf32>, vector<8x256xf32> -> vector<8x256xf32>
    %c0_3 = arith.constant 0 : index
    %c0_4 = arith.constant 0 : index
    %3 = vector.load %arg4[%c0_3, %c0_4] : memref<1x256xf32, #tpu.memory_space<vmem>>, vector<1x256xf32>
    %4 = vector.broadcast %3 : vector<1x256xf32> to vector<8x256xf32>
    %5 = arith.addf %2, %4 : vector<8x256xf32>
    %c0_5 = arith.constant 0 : index
    %c0_6 = arith.constant 0 : index
    %6 = vector.load %arg5[%c0_5, %c0_6] : memref<8x256xf32, #tpu.memory_space<vmem>>, vector<8x256xf32>
    tpu.vector_store %arg5[%c0_5, %c0_6], %5 {strides = array<i32>} : memref<8x256xf32, #tpu.memory_space<vmem>>, vector<8x256xf32>,
    return
  }
  func.func @transform_0(%arg0: i32, %arg1: i32) -> (i32, i32) {
    %c0_i32 = arith.constant 0 : i32
    %c0_i32_0 = arith.constant 0 : i32
    return %arg0, %c0_i32 : i32, i32
  }
  func.func @transform_1(%arg0: i32, %arg1: i32) -> (i32, i32) {
    %c0_i32 = arith.constant 0 : i32
    %c0_i32_0 = arith.constant 0 : i32
    return %c0_i32, %arg1 : i32, i32
  }
  func.func @transform_2(%arg0: i32, %arg1: i32) -> (i32, i32) {
    %c0_i32 = arith.constant 0 : i32
    %c0_i32_0 = arith.constant 0 : i32
    return %c0_i32, %arg1 : i32, i32
  }
  func.func @transform_3(%arg0: i32, %arg1: i32) -> (i32, i32) {
    %c0_i32 = arith.constant 0 : i32
    return %arg0, %arg1 : i32, i32
  }
}

</mosaic_0001>

<bundles_post_ra>
// kernel: euclidean_distance_forward.1
= control target key start
LH: loop header
LB: loop body
LE: loop exit
PB: predicated region body
PF: predicated region fallthrough
CT: control target
= control target key end

     0   :  { %v162_v7 = vmov 0.0   ;;  %s226_s0 = inlined_call_operand.vmem [shape: f32[8,32], index: 0, kind: input, shape index: {}]   ;;  %s227_s1 = inlined_call_operand.vmem [shape: f32[32,256], index: 1, kind: input, shape index: {}]   ;;  %s228_s2 = inlined_call_operand.vmem [shape: f32[1,256], index: 2, kind: input, shape index: {}]   ;;  %s229_s3 = inlined_call_operand.hbm [shape: f32[8,256], index: 3, kind: output, shape index: {}]  }
   0x1   :  { %v17_v0 = vld [vmem:[%s227_s1 + $0x8] sm:$0xff]  ;;  %v19_v1 = vld [vmem:[%s227_s1 + $0x18] sm:$0xff]  ;;  %v16_v2 = vld [vmem:[%s227_s1] sm:$0xff]  ;;  %104 = vmatprep.mubr.f32.mxu0 %v162_v7 }
   0x2   :  { %v128_v3 = vpack.c.bf16 %v19_v1, %v17_v0  ;;  %v18_v4 = vld [vmem:[%s227_s1 + $0x10] sm:$0xff]  ;;  %v21_v5 = vld [vmem:[%s227_s1 + $0x28] sm:$0xff]  ;;  %v23_v6 = vld [vmem:[%s227_s1 + $0x38] sm:$0xff] }
   0x3   :  { %v130_v8 = vpack.c.bf16 %v18_v4, %v16_v2  ;;  %v132_v9 = vpack.c.bf16 %v23_v6, %v21_v5  ;;  %v20_v10 = vld [vmem:[%s227_s1 + $0x20] sm:$0xff]  ;;  %v22_v11 = vld [vmem:[%s227_s1 + $0x30] sm:$0xff] }
   0x4   :  { %129 = vmatprep.subr.bf16.mxu0 %v128_v3 }
   0x5   :  { %8 = vsyncpa [#allocation3], 0  ;;  %131 = vmatpush1.bf16.msra.mxu0 %v130_v8  ;;  %v134_v12 = vpack.c.bf16 %v22_v11, %v20_v10  ;;  %v15_v13 = vld [vmem:[%s226_s0] sm:$0xff]  ;;  %vm36_vm0 = vcmask 261120   ;;  %v26_v14 = vlaneseq  ;;  %s163_s1 = smov [#allocation2]  }
   0x6   :  { %133 = vmatprep.subr.bf16.mxu0 %v132_v9  ;;  %v24_v17 = vld [vmem:[%s228_s2] sm:$0x3]  ;;  %s119_s5 = sshll.u32 %s163_s1, 4  ;;  %s120_s5 = int_to_ptr.vmem [resolvable:$true] %s119_s5 }
   0x7   :  { %v27_v15 = vshrl.u32 %v26_v14, 7  ;;  %s138_s0 = scalar_lea.vmem %s120_s5, 256  ;;  %p143_p1 = scmp.lt.s32.totalorder %s120_s5, %s120_s5 }
   0x8   :  { %p139_p0 = scmp.ne.s32.totalorder %s120_s5, %s138_s0  ;;  %p144_p2 = scmp.lt.s32.totalorder %s138_s0, %s138_s0 }
   0x9   :  { %135 = vmatpush1.bf16.msra.mxu0 %v134_v12  ;;  %v28_v16 = vsub.s32 0, %v27_v15  ;;  %v32_v18 = vsub.s32 1, %v27_v15 }
   0xa   :  { %p145_p3 = por %p144_p2, %p143_p1 }
   0xb   :  { %v29_v19 = vrot.slane %v24_v17, %v28_v16  ;;  %v33_v20 = vrot.slane %v24_v17, %v32_v18 }
   0xc   :  { %127 = vmatmul.mubr.msk.f32.vlgmr.msra.gmra.mrb[0].mxu0 %vm36_vm0, %v15_v13  ;;  %p146_p4 = pnand %p145_p3, %p139_p0 }
  0xdf   :  { %v106_v21 = vpop.f32.mrb[0].mxu0 }
  0xe0   :  { %v107_v22 = vadd.f32 %v106_v21, %v29_v19  ;;  %v108_v23 = vpop.f32.mrb[1].mxu0 }
  0xe1   :  { %v109_v24 = vadd.f32 %v108_v23, %v33_v20 }
  0xe2   :  { %111 = vst [vmem:[#allocation2] sm:$0xff] %v107_v22 }
  0xe3   :  { %112 = vst [vmem:[#allocation2 + $0x8] sm:$0xff] %v109_v24 }
  0xe4   :  { %149 = shalt.err (!%p146_p4)
}
  0xe5   :  { %s150_s7 = scalar_lea.hbm %s229_s3, 256 }
  0xe6   :  { %p151_p5 = scmp.ne.s32.totalorder %s229_s3, %s150_s7  ;;  %p154_p6 = scmp.lt.u32.totalorder %s150_s7, %s229_s3 }
  0xe8   :  { %p156_p7 = pnand %p154_p6, %p151_p5 }
  0xea   :  { %159 = shalt.err (!%p156_p7)
}
  0xeb   :  { %122 = dma.vmem_to_hbm [thread:$0]  %s120_s5, 256, %s229_s3, [#allocation3]  }
  0xec   :  { %160 = dma.done.wait [#allocation3], 256  }
  0xed   :  { %161 = vsyncadd [#allocation3], 4294967040 }
  0xee   :  { %126 = vsyncpa [#allocation3], 1 }

</bundles_post_ra>
